<compile_context>
chip_gen: v6e
topology: v6e:2x2x1
jax: 0.10.0
libtpu: 0.0.40
codegen_flags: <defaults>
</compile_context>

<pallas_src>
import functools

import jax
import jax.numpy as jnp
from jax import lax
from jax.experimental import pallas as pl
from jax.experimental.pallas import tpu as pltpu


def _round_up(n, mult):
    return ((n + mult - 1) // mult) * mult


def _pick_to(D, O):
    # Class-tile cap keeps the double-buffered bf16 weight tile + two f32
    # output tiles comfortably inside the v7x 64 MiB part.
    cap = 512 if D >= 2048 else 1024
    return min(_round_up(O, 128), cap)


def _pick_tb(B, D):
    cap = 256 if D >= 4096 else 512
    return min(_round_up(B, 8), cap)


# ---------------------------------------------------------------------------
# Hoisted x normalization: one elementwise pass over x per call.
# Emits bf16 normalized x (MXU input) and the f32 row-norm column (needed only
# for the PyTorch feature_scale=None quirk).
# ---------------------------------------------------------------------------
def _normalize_x_kernel(x_ref, xn_ref, n_ref):
    x = x_ref[...].astype(jnp.float32)
    sq = jnp.sum(x * x, axis=1, keepdims=True)
    n_ref[...] = jnp.sqrt(sq)
    # rsqrt-multiply (EUP) instead of sqrt-divide; no epsilon (faithful).
    xn_ref[...] = (x * lax.rsqrt(sq)).astype(xn_ref.dtype)


def _normalize_x(x_p, tb):
    B_pad, D = x_p.shape
    return pl.pallas_call(
        _normalize_x_kernel,
        out_shape=(jax.ShapeDtypeStruct((B_pad, D), jnp.bfloat16),
                   jax.ShapeDtypeStruct((B_pad, 1), jnp.float32)),
        grid=(B_pad // tb,),
        in_specs=[pl.BlockSpec((tb, D), lambda i: (i, 0))],
        out_specs=(pl.BlockSpec((tb, D), lambda i: (i, 0)),
                   pl.BlockSpec((tb, 1), lambda i: (i, 0))),
        compiler_params=pltpu.CompilerParams(dimension_semantics=("parallel",)),
    )(x_p)


# ---------------------------------------------------------------------------
# Once-per-weight-update prep (outside the per-call hot path; in a real layer
# this is cached alongside the parameter and redone only when it changes).
# ---------------------------------------------------------------------------
def prepare_weight(weight, *, to=None):
    O, D = weight.shape
    if to is None:
        to = _pick_to(D, O)
    O_pad = _round_up(O, to)
    w = weight.astype(jnp.float32)
    w_norm = jnp.sqrt(jnp.sum(w * w, axis=1))                 # (O,)  ||w_j||
    w_n = (w / w_norm[:, None]).astype(jnp.bfloat16)          # unit rows, bf16
    # K-major, class-padded with ZEROS so padded columns give cos = 0 (no NaN).
    wT = jnp.zeros((D, O_pad), jnp.bfloat16).at[:, :O].set(w_n.T)
    # Per-class norm row, padded with 0 -> padded outputs are 0, sliced off.
    wnr = jnp.zeros((1, O_pad), jnp.float32).at[0, :O].set(w_norm)
    return wT, wnr, to, O


# ---------------------------------------------------------------------------
# Main fused kernel: per (batch tile i, class tile j)
#   cos = clip(xn_bf16 @ wTn_bf16, -1, 1)    (f32 accumulation)
#   xw  = cos * scale ; fm = xw - m * scale  (scale from precomputed rows /
#                                             static scalars)
# ---------------------------------------------------------------------------
def _make_margin_kernel(has_wnr, has_xnr, m, weight_scale, feature_scale):
    def kernel(*refs):
        it = iter(refs)
        xn_ref = next(it)
        wT_ref = next(it)
        wnr_ref = next(it) if has_wnr else None
        xnr_ref = next(it) if has_xnr else None
        xw_ref = next(it)
        fm_ref = next(it)

        # bf16 MXU matmul, f32 accumulate.
        s = jnp.dot(xn_ref[...], wT_ref[...],
                    preferred_element_type=jnp.float32)        # (tb, to)
        cos = jnp.clip(s, -1.0, 1.0)

        # Combined scale; branches are static at trace time.
        scale = None
        if weight_scale is None:
            scale = wnr_ref[...]                               # (1, to) ||w_j||
        elif weight_scale != 1:
            scale = jnp.float32(weight_scale)
        if feature_scale is None:
            sx = xnr_ref[...]                                  # (1, to) quirk
            scale = sx if scale is None else scale * sx
        elif feature_scale != 1:
            fs = jnp.float32(feature_scale)
            scale = fs if scale is None else scale * fs

        if scale is None:
            xw_ref[...] = cos
            fm_ref[...] = cos - jnp.float32(m)
        else:
            xw = cos * scale
            xw_ref[...] = xw
            fm_ref[...] = xw - jnp.float32(m) * scale
    return kernel


# ---------------------------------------------------------------------------
# Wrapper
# ---------------------------------------------------------------------------
def additive_cosine_margin_linear(x, weight=None, *, m=4, weight_scale=None,
                                  feature_scale=None, prepared=None, tb=None):
    """x: (B, in_channels) f32; weight: (out_channels, in_channels) f32.
    Returns (x_dot_wT, f_m), each (B, out_channels) f32.
    Pass `prepared=prepare_weight(weight)` to amortize the weight prep."""
    B, D = x.shape
    if prepared is None:
        prepared = prepare_weight(weight)
    wT, wnr, to, O = prepared
    Dw, O_pad = wT.shape
    assert Dw == D

    if tb is None:
        tb = _pick_tb(B, D)
    B_pad = _round_up(B, tb)

    x = x.astype(jnp.float32)
    # Pad the batch with ONES so padded rows don't produce NaN norms; padded
    # rows/columns are sliced off at the end.
    x_p = x if B_pad == B else jnp.pad(
        x, ((0, B_pad - B), (0, 0)), constant_values=1.0)

    # Hoisted x normalization (one pass); frees the inner class sweep of any
    # scratch caching so both grid axes can be "parallel" (v7x megacore).
    xn, xnorm = _normalize_x(x_p, tb)

    inputs = [xn, wT]
    in_specs = [
        pl.BlockSpec((tb, D), lambda i, j: (i, 0)),    # xn: fixed over j
        # TODO(synk): add pipeline_mode=pl.Buffered(3) on this weight spec if
        # profiling shows exposed DMA after the bf16 switch (mind v7x VMEM).
        pl.BlockSpec((D, to), lambda i, j: (0, j)),    # weight streams over j
    ]
    has_wnr = weight_scale is None
    has_xnr = feature_scale is None
    if has_wnr:
        inputs.append(wnr)
        in_specs.append(pl.BlockSpec((1, to), lambda i, j: (0, j)))
    if has_xnr:
        # PyTorch quirk: x_norm.view(1, -1) broadcast over class columns;
        # only valid when out_channels == batch.
        assert O == B, "feature_scale=None requires out_channels == batch"
        xnr = jnp.zeros((1, O_pad), jnp.float32).at[0, :O].set(xnorm[:O, 0])
        inputs.append(xnr)
        in_specs.append(pl.BlockSpec((1, to), lambda i, j: (0, j)))

    kernel = _make_margin_kernel(has_wnr, has_xnr, m, weight_scale,
                                 feature_scale)

    # Explicit VMEM limit with headroom: double-buffered bf16 xn + weight
    # tiles, two double-buffered f32 output tiles, tiny scale rows.
    # TODO(synk): for very large D (>= ~16K) add a K-reduction grid axis.
    footprint = (2 * tb * D * 2 + 2 * D * to * 2 + 4 * tb * to * 4
                 + 8 * to * 4)
    vmem_limit = int(min(max(footprint + (4 << 20), 32 << 20), 100 << 20))

    # TODO(synk): downstream-permitting, emit xw/fm as bf16 (halves output HBM
    # traffic); kept f32 here for parity with the PyTorch module.
    xw, fm = pl.pallas_call(
        kernel,
        out_shape=(jax.ShapeDtypeStruct((B_pad, O_pad), jnp.float32),
                   jax.ShapeDtypeStruct((B_pad, O_pad), jnp.float32)),
        grid=(B_pad // tb, O_pad // to),
        in_specs=in_specs,
        out_specs=(pl.BlockSpec((tb, to), lambda i, j: (i, j)),
                   pl.BlockSpec((tb, to), lambda i, j: (i, j))),
        compiler_params=pltpu.CompilerParams(
            dimension_semantics=("parallel", "parallel"),
            vmem_limit_bytes=vmem_limit),
    )(*inputs)

    if B_pad != B or O_pad != O:
        xw = xw[:B, :O]
        fm = fm[:B, :O]
    return xw, fm


# ---------------------------------------------------------------------------
# References for verification.
# ---------------------------------------------------------------------------
def _apply_scales(cos, m, w_norm, x_norm, weight_scale, feature_scale):
    xw, fm = cos, cos - m
    if weight_scale is None:
        xw = xw * w_norm.reshape(1, -1)
        fm = fm * w_norm.reshape(1, -1)
    elif weight_scale != 1:
        xw = xw * weight_scale
        fm = fm * weight_scale
    if feature_scale is None:
        xw = xw * x_norm.reshape(1, -1)
        fm = fm * x_norm.reshape(1, -1)
    elif feature_scale != 1:
        xw = xw * feature_scale
        fm = fm * feature_scale
    return xw, fm


def _reference_f32(x, weight, m, weight_scale, feature_scale):
    # Exact transliteration of the PyTorch forward (full f32 matmul).
    w_norm = jnp.sqrt(jnp.sum(weight ** 2, axis=1, keepdims=True))
    x_norm = jnp.sqrt(jnp.sum(x ** 2, axis=1, keepdims=True))
    cos = jnp.clip(jnp.dot(x / x_norm, (weight / w_norm).T,
                           precision=lax.Precision.HIGHEST), -1.0, 1.0)
    return _apply_scales(cos, m, w_norm, x_norm, weight_scale, feature_scale)


def _reference_bf16(x, weight, m, weight_scale, feature_scale):
    # Same dtype choices as the kernel (bf16 normalized operands, f32 acc).
    w = weight.astype(jnp.float32)
    w_norm = jnp.sqrt(jnp.sum(w * w, axis=1, keepdims=True))
    wn = (w / w_norm).astype(jnp.bfloat16)
    xf = x.astype(jnp.float32)
    x_sq = jnp.sum(xf * xf, axis=1, keepdims=True)
    x_norm = jnp.sqrt(x_sq)
    xn = (xf * lax.rsqrt(x_sq)).astype(jnp.bfloat16)
    cos = jnp.clip(jnp.dot(xn, wn.T, preferred_element_type=jnp.float32),
                   -1.0, 1.0)
    return _apply_scales(cos, m, w_norm, x_norm, weight_scale, feature_scale)


if __name__ == "__main__":
    key = jax.random.PRNGKey(0)
    kx, kw, kx2, kw2 = jax.random.split(key, 4)

    # Config 1: module defaults (m=4, weight_scale=None, feature_scale=None).
    # feature_scale=None -> PyTorch (1, B) broadcast requires out == batch.
    in_channels, out_channels, batch = 32, 8, 8
    xavier_std = (2.0 / (in_channels + out_channels)) ** 0.5
    weight = xavier_std * jax.random.normal(
        kw, (out_channels, in_channels), dtype=jnp.float32)
    x = jax.random.normal(kx, (batch, in_channels), dtype=jnp.float32)

    prepped = prepare_weight(weight)          # once-per-weight-update prep
    xw, fm = additive_cosine_margin_linear(
        x, m=4, weight_scale=None, feature_scale=None, prepared=prepped)
    jax.block_until_ready((xw, fm))

    # Strict check vs. a reference with the same bf16 matmul dtype choices.
    bxw, bfm = _reference_bf16(x, weight, 4, None, None)
    assert jnp.allclose(xw, bxw, atol=5e-3, rtol=5e-3), "xw mismatch vs bf16 ref (cfg1)"
    assert jnp.allclose(fm, bfm, atol=5e-3, rtol=5e-3), "fm mismatch vs bf16 ref (cfg1)"
    # Loose check vs. the exact f32 PyTorch transliteration (bf16 rounding).
    rxw, rfm = _reference_f32(x, weight, 4, None, None)
    assert jnp.allclose(xw, rxw, atol=2e-1, rtol=5e-2), "xw mismatch vs f32 ref (cfg1)"
    assert jnp.allclose(fm, rfm, atol=2e-1, rtol=5e-2), "fm mismatch vs f32 ref (cfg1)"

    # Config 2: scalar scales (exercises the other branches; B != O allowed).
    out2, b2 = 16, 8
    xavier_std2 = (2.0 / (in_channels + out2)) ** 0.5
    w2 = xavier_std2 * jax.random.normal(kw2, (out2, in_channels), jnp.float32)
    x2 = jax.random.normal(kx2, (b2, in_channels), jnp.float32)
    xw2, fm2 = additive_cosine_margin_linear(
        x2, w2, m=4, weight_scale=2.0, feature_scale=0.5)
    jax.block_until_ready((xw2, fm2))

    bxw2, bfm2 = _reference_bf16(x2, w2, 4, 2.0, 0.5)
    assert jnp.allclose(xw2, bxw2, atol=5e-3, rtol=5e-3), "xw mismatch vs bf16 ref (cfg2)"
    assert jnp.allclose(fm2, bfm2, atol=5e-3, rtol=5e-3), "fm mismatch vs bf16 ref (cfg2)"
    rxw2, rfm2 = _reference_f32(x2, w2, 4, 2.0, 0.5)
    assert jnp.allclose(xw2, rxw2, atol=5e-2, rtol=5e-2), "xw mismatch vs f32 ref (cfg2)"
    assert jnp.allclose(fm2, rfm2, atol=5e-2, rtol=5e-2), "fm mismatch vs f32 ref (cfg2)"

    print("KERNEL_OK")
</pallas_src>

<mosaic_0001>
module attributes {stable_mosaic.version = 11 : i64} {
  func.func @_normalize_x_kernel(%arg0: i32, %arg1: memref<8x32xf32, #tpu.memory_space<vmem>>, %arg2: memref<8x32xbf16, #tpu.memory_space<vmem>>, %arg3: memref<8x1xf32, #tpu.memory_space<vmem>>) attributes {dimension_semantics = [#tpu.dimension_semantics<parallel>], iteration_bounds = array<i64: 1>, scalar_prefetch = 0 : i64, scratch_operands = 0 : i64, tpu.core_type = #tpu.core_type<tc>, window_params = [{transform_indices = @transform_0, window_bounds = array<i64: 8, 32>}, {transform_indices = @transform_1, window_bounds = array<i64: 8, 32>}, {transform_indices = @transform_2, window_bounds = array<i64: 8, 1>}]} {
    %c0 = arith.constant 0 : index
    %c0_0 = arith.constant 0 : index
    %0 = vector.load %arg1[%c0, %c0_0] : memref<8x32xf32, #tpu.memory_space<vmem>>, vector<8x32xf32>
    %1 = arith.mulf %0, %0 : vector<8x32xf32>
    %cst = arith.constant dense<0.000000e+00> : vector<8xf32>
    %2 = vector.multi_reduction <add>, %1, %cst [1] : vector<8x32xf32> to vector<8xf32>
    %3 = vector.shape_cast %2 : vector<8xf32> to vector<8x1xf32>
    %4 = math.sqrt %3 : vector<8x1xf32>
    %c0_1 = arith.constant 0 : index
    %c0_2 = arith.constant 0 : index
    %5 = vector.load %arg3[%c0_1, %c0_2] : memref<8x1xf32, #tpu.memory_space<vmem>>, vector<8x1xf32>
    tpu.vector_store %arg3[%c0_1, %c0_2], %4 {strides = array<i32>} : memref<8x1xf32, #tpu.memory_space<vmem>>, vector<8x1xf32>,
    %6 = math.rsqrt %3 : vector<8x1xf32>
    %7 = vector.broadcast %6 : vector<8x1xf32> to vector<8x32xf32>
    %8 = arith.mulf %0, %7 : vector<8x32xf32>
    %9 = arith.truncf %8 : vector<8x32xf32> to vector<8x32xbf16>
    %c0_3 = arith.constant 0 : index
    %c0_4 = arith.constant 0 : index
    %10 = vector.load %arg2[%c0_3, %c0_4] : memref<8x32xbf16, #tpu.memory_space<vmem>>, vector<8x32xbf16>
    tpu.vector_store %arg2[%c0_3, %c0_4], %9 {strides = array<i32>} : memref<8x32xbf16, #tpu.memory_space<vmem>>, vector<8x32xbf16>,
    return
  }
  func.func @transform_0(%arg0: i32) -> (i32, i32) {
    %c0_i32 = arith.constant 0 : i32
    %c0_i32_0 = arith.constant 0 : i32
    return %arg0, %c0_i32 : i32, i32
  }
  func.func @transform_1(%arg0: i32) -> (i32, i32) {
    %c0_i32 = arith.constant 0 : i32
    %c0_i32_0 = arith.constant 0 : i32
    return %arg0, %c0_i32 : i32, i32
  }
  func.func @transform_2(%arg0: i32) -> (i32, i32) {
    %c0_i32 = arith.constant 0 : i32
    %c0_i32_0 = arith.constant 0 : i32
    return %arg0, %c0_i32 : i32, i32
  }
}

</mosaic_0001>

<bundles_post_ra>
// kernel: tpu_custom_call.1
= control target key start
LH: loop header
LB: loop body
LE: loop exit
PB: predicated region body
PF: predicated region fallthrough
CT: control target
= control target key end

     0   :  { %8 = vsyncpa [#allocation3], 0  ;;  %s136_s0 = inlined_call_operand.hbm [shape: f32[8,32], index: 0, kind: input, shape index: {}]   ;;  %s137_s1 = inlined_call_operand.hbm [shape: bf16[8,32], index: 1, kind: output, shape index: {0}]   ;;  %s138_s2 = inlined_call_operand.vmem [shape: f32[8,1], index: 2, kind: output, shape index: {1}]  }
   0x1   :  { %9 = vsyncpa [#allocation4], 0  ;;  %s110_s9 = smov [#allocation2]  }
   0x2   :  { %s16_s10 = sshll.u32 %s110_s9, 4  ;;  %s17_s10 = int_to_ptr.vmem [resolvable:$true] %s16_s10 }
   0x3   :  { %s74_s11 = scalar_lea.vmem %s17_s10, 128  ;;  %p79_p1 = scmp.lt.s32.totalorder %s17_s10, %s17_s10 }
   0x4   :  { %p75_p0 = scmp.ne.s32.totalorder %s17_s10, %s74_s11  ;;  %p80_p2 = scmp.lt.s32.totalorder %s74_s11, %s74_s11 }
   0x6   :  { %p81_p3 = por %p80_p2, %p79_p1 }
   0x8   :  { %p82_p4 = pnand %p81_p3, %p75_p0 }
   0xa   :  { %85 = shalt.err (!%p82_p4)
}
   0xb   :  { %19 = dma.hbm_to_vmem [thread:$0]  %s136_s0, 128, %s17_s10, [#allocation3]  }
   0xc   :  { %106 = dma.done.wait [#allocation3], 128  }
   0xd   :  { %107 = vsyncadd [#allocation3], 4294967168  ;;  %v23_v0 = vld [vmem:[#allocation2] sm:$0xff]  ;;  %vm25_vm0 = vcmask 261120   ;;  %s111_s14 = smov [#allocation5]   ;;  %vm36_vm2 = vcmask 7168  }
   0xe   :  { %v24_v1 = vmul.f32 %v23_v0, %v23_v0  ;;  %s49_s15 = sshll.u32 %s111_s14, 4  ;;  %vm41_vm3 = vcmask 257024   ;;  %s50_s15 = int_to_ptr.vmem [resolvable:$true] %s49_s15 }
   0xf   :  { %s86_s17 = scalar_lea.vmem %s50_s15, 64  ;;  %p91_p6 = scmp.lt.s32.totalorder %s50_s15, %s50_s15 }
  0x10   :  { %v26_v2 = vsel %vm25_vm0, %v24_v1, 0.0  ;;  %p87_p5 = scmp.ne.s32.totalorder %s50_s15, %s86_s17  ;;  %p92_p7 = scmp.lt.s32.totalorder %s86_s17, %s86_s17 }
  0x11   :  { %27 = vadd.xlane.f32.xlu0 %v26_v2 }
  0x12   :  { %p93_p8 = por %p92_p7, %p91_p6 }
  0x14   :  { %p94_p9 = pnand %p93_p8, %p87_p5 }
  0x9a   :  { %v28_v3 = vpop.xlane.xlu0 %27 }
  0x9b   :  { %64 = vrsqrt.f32 %v28_v3  ;;  %vm31_vm1 = vcmp.eq.f32.partialorder %v28_v3, inf  ;;  %v34_v7 = vand.u32 2147483648, %v28_v3  ;;  %vm33_vm4 = vcmp.eq.f32.partialorder %v28_v3, 0.0 }
  0xa8   :  { %v65_v4 = vpop.eup %64 }
  0xa9   :  { %v30_v5 = vmul.f32 %v65_v4, %v28_v3  ;;  %v39_v6 = vmul.f32 %v65_v4, %v23_v0 }
  0xab   :  { %v32_v8 = vsel %vm31_vm1, %v28_v3, %v30_v5  ;;  %v40_v9 = vpack.c.bf16 %v39_v6, %v39_v6 }
  0xac   :  { %v35_v10 = vsel %vm33_vm4, %v34_v7, %v32_v8 }
  0xad   :  { %37 = vst.msk [vmem:[%s138_s2] sm:$0xff] %vm36_vm2, %v35_v10 }
  0xae   :  { %42 = vst.msk [vmem:[#allocation5] sm:$0xf] %vm41_vm3, %v40_v9 }
  0xaf   :  { %97 = shalt.err (!%p94_p9)
}
  0xb0   :  { %52 = dma.vmem_to_hbm [thread:$0]  %s50_s15, 64, %s137_s1, [#allocation4]  }
  0xb1   :  { %108 = dma.done.wait [#allocation4], 64  }
  0xb2   :  { %109 = vsyncadd [#allocation4], 4294967232 }
  0xb3   :  { %60 = vsyncpa [#allocation3], 1 }
  0xb4   :  { %61 = vsyncpa [#allocation4], 1 }

</bundles_post_ra>
